<compile_context>
chip_gen: v6e
topology: v6e:2x2x1
jax: 0.10.0
libtpu: 0.0.40
codegen_flags: <defaults>
</compile_context>

<pallas_src>
import functools

import jax
import jax.numpy as jnp
from jax.experimental import pallas as pl
from jax.experimental.pallas import tpu as pltpu


def _round_up(x, m):
    return ((x + m - 1) // m) * m


def _pad2(a, rows, cols):
    """Zero-pad a 2-D array to (rows, cols); no-op (no copy) if already that shape."""
    if a.shape == (rows, cols):
        return a
    return jnp.zeros((rows, cols), a.dtype).at[: a.shape[0], : a.shape[1]].set(a)


def _vmem_budget_bytes():
    """~80% of physical VMEM: ~51 MiB on v7x (64 MiB), ~102 MiB on v5e/v6e (128 MiB)."""
    cap = 64 * 1024 * 1024  # conservative fallback = v7x physical
    try:
        info = pltpu.get_tpu_info()
        cap = int(getattr(info, "vmem_capacity_bytes", cap) or cap)
    except Exception:
        pass
    return int(cap * 0.8)


# --------------------------------------------------------------------------- kernel

def gated_linear_kernel(x_ref, w_ref, b_ref, o_ref, *, tn, compute_dtype):
    # Cast the x tile in-kernel (VPU) so the wrapper never rewrites x in HBM.
    x = x_ref[...].astype(compute_dtype)
    # One fused MXU matmul per block: (tm, Kp) @ (Kp, 2*tn) -> f32 accumulation.
    h = jnp.dot(x, w_ref[...], preferred_element_type=jnp.float32)
    h = h + b_ref[...]
    # tn is a multiple of 128 -> lane-aligned, layout-free split of the two gates.
    # TODO(synk): for very wide 2*tn, chunk this epilogue over ~512-lane slices to
    # shrink live f32 temps (only matters when tn was not already bounded by VMEM).
    o_ref[...] = (jnp.tanh(h[:, :tn]) * jax.nn.sigmoid(h[:, tn:])).astype(o_ref.dtype)


# --------------------------------------------------------- one-time parameter fusion

def prepare_gated_linear_params(w1, b1, w2, b2, *, compute_dtype=jnp.bfloat16):
    """One-time (model-init) fusion of the two Linear layers.

    w1, w2: (K, N) -- transpose of the PyTorch nn.Linear weight (out_ch, in_ch).
    b1, b2: (N,) or (1, N).
    Returns a params dict consumed by gated_linear().
    """
    K, N = w1.shape
    assert w2.shape == (K, N)
    b1 = jnp.reshape(b1, (1, N)).astype(jnp.float32)
    b2 = jnp.reshape(b2, (1, N)).astype(jnp.float32)

    Kp = _round_up(K, 128)
    Np = _round_up(N, 128)
    c_itemsize = jnp.dtype(compute_dtype).itemsize
    budget = _vmem_budget_bytes()

    # ---- choose per-block gate width tn (multiple of 128) ----------------------
    tm_guess = 512

    def _need(tn, wbuf):
        return (Kp * 2 * tn * c_itemsize * wbuf        # fused weight buffer(s)
                + 2 * tn * 4 * wbuf                    # fused bias buffer(s)
                + 2 * tm_guess * Kp * 4                # double-buffered x tile (f32 worst case)
                + 2 * tm_guess * tn * 4                # double-buffered out tile
                + tm_guess * 2 * tn * 4)               # f32 matmul intermediate

    if _need(Np, 1) <= budget:
        tn = Np                                        # whole fused weight stays resident
    else:
        tn = Np
        while tn > 128 and _need(tn, 2) > budget:      # stream double-buffered blocks
            tn = _round_up(tn // 2, 128)
        tn = max(128, tn)
    Np = _round_up(N, tn)                              # re-pad so tn divides Np exactly
    grid_n = Np // tn

    # ---- fused weight/bias with W1/W2 columns interleaved per tn block ----------
    # block j (width 2*tn) = [ W1[:, j*tn:(j+1)*tn] | W2[:, j*tn:(j+1)*tn] ]
    w1p = _pad2(w1, Kp, Np).astype(compute_dtype)
    w2p = _pad2(w2, Kp, Np).astype(compute_dtype)
    w_fused = jnp.concatenate(
        [w1p.reshape(Kp, grid_n, tn), w2p.reshape(Kp, grid_n, tn)], axis=2
    ).reshape(Kp, grid_n * 2 * tn)
    b1p = _pad2(b1, 1, Np)
    b2p = _pad2(b2, 1, Np)
    b_fused = jnp.concatenate(
        [b1p.reshape(1, grid_n, tn), b2p.reshape(1, grid_n, tn)], axis=2
    ).reshape(1, grid_n * 2 * tn)

    return dict(
        w_fused=w_fused, b_fused=b_fused,
        K=K, N=N, Kp=Kp, Np=Np, tn=tn, grid_n=grid_n,
        compute_dtype=compute_dtype, vmem_budget=budget,
    )


# ------------------------------------------------------------------------- wrapper

def gated_linear(x, params, *, tm=None, out_dtype=None):
    """out = tanh(x @ w1 + b1) * sigmoid(x @ w2 + b2).   x: (M, K) -> (M, N)."""
    M, K = x.shape
    assert K == params["K"], (K, params["K"])
    N, Kp, Np = params["N"], params["Kp"], params["Np"]
    tn, grid_n = params["tn"], params["grid_n"]
    compute_dtype = params["compute_dtype"]
    w_fused, b_fused = params["w_fused"], params["b_fused"]
    budget = params["vmem_budget"]
    out_dtype = out_dtype or x.dtype

    x_itemsize = jnp.dtype(x.dtype).itemsize
    c_itemsize = jnp.dtype(compute_dtype).itemsize
    out_itemsize = jnp.dtype(out_dtype).itemsize

    # ---- row tile: 512-class on 128 MiB parts, 256-class on v7x -----------------
    if tm is None:
        tm = 512 if budget > 64 * 1024 * 1024 else 256
    tm = max(8, min(_round_up(tm, 8), _round_up(M, 8)))
    if tm > 128:
        tm = _round_up(tm, 128)                        # MXU-friendly multiples of 128
        half = _round_up(pl.cdiv(M, 2), 128)
        if half < tm:
            tm = half                                  # grid_m >= 2 -> v7x megacore split
    # Shrink tm if x/out tiles + f32 intermediate don't fit beside the weight block(s).
    wbuf = 1 if grid_n == 1 else 2
    w_bytes = (Kp * 2 * tn * c_itemsize + 2 * tn * 4) * wbuf

    def _tiles(t):
        return 2 * t * Kp * x_itemsize + 2 * t * tn * out_itemsize + t * 2 * tn * 4

    while tm > 8 and w_bytes + _tiles(tm) > budget:
        tm = max(8, _round_up(tm // 2, 8))
        if tm > 128:
            tm = _round_up(tm, 128)
    Mp = _round_up(M, tm)
    grid_m = Mp // tm

    # x: pad only if needed, never cast in the wrapper (kernel casts the tile).
    x_p = _pad2(x, Mp, Kp)

    kernel = functools.partial(gated_linear_kernel, tn=tn, compute_dtype=compute_dtype)

    cost = pl.CostEstimate(
        flops=2 * Mp * Kp * 2 * Np,
        transcendentals=2 * Mp * Np,                   # tanh + sigmoid
        bytes_accessed=(grid_n * Mp * Kp * x_itemsize
                        + Kp * 2 * Np * c_itemsize
                        + 2 * Np * 4
                        + Mp * Np * out_itemsize),
    )

    def _run(single_buffer_weight):
        w_kw = {}
        b_kw = {}
        if single_buffer_weight and hasattr(pl, "Buffered"):
            # Constant index_map -> nothing to prefetch: single buffer halves the
            # resident weight footprint (the biggest VMEM lever, esp. on v7x).
            w_kw = dict(pipeline_mode=pl.Buffered(1))
            b_kw = dict(pipeline_mode=pl.Buffered(1))
        in_specs = [
            pl.BlockSpec((tm, Kp), lambda j, i: (i, 0)),               # x row tile
            pl.BlockSpec((Kp, 2 * tn), lambda j, i: (0, j), **w_kw),   # fused weight block
            pl.BlockSpec((1, 2 * tn), lambda j, i: (0, j), **b_kw),    # fused bias block
        ]
        out_spec = pl.BlockSpec((tm, tn), lambda j, i: (i, j))
        return pl.pallas_call(
            kernel,
            out_shape=jax.ShapeDtypeStruct((Mp, Np), out_dtype),
            grid_spec=pltpu.PrefetchScalarGridSpec(
                num_scalar_prefetch=0,
                grid=(grid_n, grid_m),       # weight block outer (fetched once), rows inner
                in_specs=in_specs,
                out_specs=out_spec,
            ),
            compiler_params=pltpu.CompilerParams(
                dimension_semantics=("parallel", "parallel"),
                vmem_limit_bytes=budget,     # always set (v5e scoped default is only 16 MiB)
            ),
            cost_estimate=cost,
        )(x_p, w_fused, b_fused)

    if grid_n == 1:
        try:
            out_p = _run(True)               # resident, single-buffered weight/bias
        except Exception:
            out_p = _run(False)              # fallback if Buffered(1) is unsupported
    else:
        out_p = _run(False)                  # streamed weight blocks: keep double-buffering

    if (Mp, Np) != (M, N):
        out_p = out_p[:M, :N]
    return out_p


if __name__ == "__main__":
    key = jax.random.PRNGKey(0)
    k_x, k_w1, k_b1, k_w2, k_b2 = jax.random.split(key, 5)

    batch, in_ch, out_ch = 8, 32, 32

    x = jax.random.normal(k_x, (batch, in_ch), dtype=jnp.float32)
    # PyTorch nn.Linear weight is (out_ch, in_ch); we store the transpose so the
    # kernel computes x @ W directly.
    w1 = jax.random.normal(k_w1, (in_ch, out_ch), dtype=jnp.float32) * 0.1
    b1 = jax.random.normal(k_b1, (out_ch,), dtype=jnp.float32) * 0.1
    w2 = jax.random.normal(k_w2, (in_ch, out_ch), dtype=jnp.float32) * 0.1
    b2 = jax.random.normal(k_b2, (out_ch,), dtype=jnp.float32) * 0.1

    # One-time fusion / padding / bf16 cast (model init), hoisted out of the call path.
    params = prepare_gated_linear_params(w1, b1, w2, b2)

    out = gated_linear(x, params)
    out = jax.block_until_ready(out)

    # Pure-JAX f32 reference (kernel uses bf16 MXU inputs with f32 accumulation,
    # so tolerance is loosened accordingly).
    ref = jnp.tanh(x @ w1 + b1[None, :]) * jax.nn.sigmoid(x @ w2 + b2[None, :])
    assert out.shape == (batch, out_ch)
    assert jnp.allclose(out, ref, atol=2e-2, rtol=2e-2), float(jnp.max(jnp.abs(out - ref)))

    print("KERNEL_OK")
</pallas_src>

<mosaic_0001>
module attributes {stable_mosaic.version = 11 : i64} {
  func.func @gated_linear_kernel(%arg0: i32, %arg1: i32, %arg2: memref<8x128xf32, #tpu.memory_space<vmem>>, %arg3: memref<128x256xbf16, #tpu.memory_space<vmem>>, %arg4: memref<1x256xf32, #tpu.memory_space<vmem>>, %arg5: memref<8x128xf32, #tpu.memory_space<vmem>>) attributes {dimension_semantics = [#tpu.dimension_semantics<parallel>, #tpu.dimension_semantics<parallel>], iteration_bounds = array<i64: 1, 1>, scalar_prefetch = 0 : i64, scratch_operands = 0 : i64, tpu.core_type = #tpu.core_type<tc>, window_params = [{transform_indices = @transform_0, window_bounds = array<i64: 8, 128>}, {pipeline_mode = #tpu.pipeline_mode<synchronous>, transform_indices = @transform_1, window_bounds = array<i64: 128, 256>}, {pipeline_mode = #tpu.pipeline_mode<synchronous>, transform_indices = @transform_2, window_bounds = array<i64: 1, 256>}, {transform_indices = @transform_3, window_bounds = array<i64: 8, 128>}]} {
    %c0 = arith.constant 0 : index
    %c0_0 = arith.constant 0 : index
    %0 = vector.load %arg2[%c0, %c0_0] : memref<8x128xf32, #tpu.memory_space<vmem>>, vector<8x128xf32>
    %1 = arith.truncf %0 : vector<8x128xf32> to vector<8x128xbf16>
    %c0_1 = arith.constant 0 : index
    %c0_2 = arith.constant 0 : index
    %2 = vector.load %arg3[%c0_1, %c0_2] : memref<128x256xbf16, #tpu.memory_space<vmem>>, vector<128x256xbf16>
    %cst = arith.constant dense<0.000000e+00> : vector<8x256xf32>
    %3 = tpu.matmul %1, %2, %cst {dimension_numbers = #tpu.dot_dimension_numbers<[1], [0], [0], [1], [0, 0, 1, 1], [], []>} : vector<8x128xbf16>, vector<128x256xbf16>, vector<8x256xf32> -> vector<8x256xf32>
    %c0_3 = arith.constant 0 : index
    %c0_4 = arith.constant 0 : index
    %4 = vector.load %arg4[%c0_3, %c0_4] : memref<1x256xf32, #tpu.memory_space<vmem>>, vector<1x256xf32>
    %5 = vector.broadcast %4 : vector<1x256xf32> to vector<8x256xf32>
    %6 = arith.addf %3, %5 : vector<8x256xf32>
    %7 = vector.extract_strided_slice %6 {offsets = [0, 0], sizes = [8, 128], strides = [1, 1]} : vector<8x256xf32> to vector<8x128xf32>
    %8 = math.tanh %7 : vector<8x128xf32>
    %9 = vector.extract_strided_slice %6 {offsets = [0, 128], sizes = [8, 128], strides = [1, 1]} : vector<8x256xf32> to vector<8x128xf32>
    %10 = arith.negf %9 : vector<8x128xf32>
    %11 = math.exp %10 : vector<8x128xf32>
    %cst_5 = arith.constant 1.000000e+00 : f32
    %12 = vector.broadcast %cst_5 : f32 to vector<8x128xf32>
    %13 = arith.addf %12, %11 : vector<8x128xf32>
    %14 = arith.divf %12, %13 : vector<8x128xf32>
    %15 = arith.mulf %8, %14 : vector<8x128xf32>
    %c0_6 = arith.constant 0 : index
    %c0_7 = arith.constant 0 : index
    %16 = vector.load %arg5[%c0_6, %c0_7] : memref<8x128xf32, #tpu.memory_space<vmem>>, vector<8x128xf32>
    tpu.vector_store %arg5[%c0_6, %c0_7], %15 {strides = array<i32>} : memref<8x128xf32, #tpu.memory_space<vmem>>, vector<8x128xf32>,
    return
  }
  func.func @transform_0(%arg0: i32, %arg1: i32) -> (i32, i32) {
    %c0_i32 = arith.constant 0 : i32
    %c0_i32_0 = arith.constant 0 : i32
    return %arg1, %c0_i32 : i32, i32
  }
  func.func @transform_1(%arg0: i32, %arg1: i32) -> (i32, i32) {
    %c0_i32 = arith.constant 0 : i32
    %c0_i32_0 = arith.constant 0 : i32
    return %c0_i32, %arg0 : i32, i32
  }
  func.func @transform_2(%arg0: i32, %arg1: i32) -> (i32, i32) {
    %c0_i32 = arith.constant 0 : i32
    %c0_i32_0 = arith.constant 0 : i32
    return %c0_i32, %arg0 : i32, i32
  }
  func.func @transform_3(%arg0: i32, %arg1: i32) -> (i32, i32) {
    %c0_i32 = arith.constant 0 : i32
    return %arg1, %arg0 : i32, i32
  }
}

module attributes {stable_mosaic.version = 11 : i64} {
  func.func @gated_linear_kernel(%arg0: i32, %arg1: i32, %arg2: memref<8x128xf32, #tpu.memory_space<vmem>>, %arg3: memref<128x256xbf16, #tpu.memory_space<vmem>>, %arg4: memref<1x256xf32, #tpu.memory_space<vmem>>, %arg5: memref<8x128xf32, #tpu.memory_space<vmem>>) attributes {dimension_semantics = [#tpu.dimension_semantics<parallel>, #tpu.dimension_semantics<parallel>], iteration_bounds = array<i64: 1, 1>, scalar_prefetch = 0 : i64, scratch_operands = 0 : i64, tpu.core_type = #tpu.core_type<tc>, window_params = [{transform_indices = @transform_0, window_bounds = array<i64: 8, 128>}, {transform_indices = @transform_1, window_bounds = array<i64: 128, 256>}, {transform_indices = @transform_2, window_bounds = array<i64: 1, 256>}, {transform_indices = @transform_3, window_bounds = array<i64: 8, 128>}]} {
    %c0 = arith.constant 0 : index
    %c0_0 = arith.constant 0 : index
    %0 = vector.load %arg2[%c0, %c0_0] : memref<8x128xf32, #tpu.memory_space<vmem>>, vector<8x128xf32>
    %1 = arith.truncf %0 : vector<8x128xf32> to vector<8x128xbf16>
    %c0_1 = arith.constant 0 : index
    %c0_2 = arith.constant 0 : index
    %2 = vector.load %arg3[%c0_1, %c0_2] : memref<128x256xbf16, #tpu.memory_space<vmem>>, vector<128x256xbf16>
    %cst = arith.constant dense<0.000000e+00> : vector<8x256xf32>
    %3 = tpu.matmul %1, %2, %cst {dimension_numbers = #tpu.dot_dimension_numbers<[1], [0], [0], [1], [0, 0, 1, 1], [], []>} : vector<8x128xbf16>, vector<128x256xbf16>, vector<8x256xf32> -> vector<8x256xf32>
    %c0_3 = arith.constant 0 : index
    %c0_4 = arith.constant 0 : index
    %4 = vector.load %arg4[%c0_3, %c0_4] : memref<1x256xf32, #tpu.memory_space<vmem>>, vector<1x256xf32>
    %5 = vector.broadcast %4 : vector<1x256xf32> to vector<8x256xf32>
    %6 = arith.addf %3, %5 : vector<8x256xf32>
    %7 = vector.extract_strided_slice %6 {offsets = [0, 0], sizes = [8, 128], strides = [1, 1]} : vector<8x256xf32> to vector<8x128xf32>
    %8 = math.tanh %7 : vector<8x128xf32>
    %9 = vector.extract_strided_slice %6 {offsets = [0, 128], sizes = [8, 128], strides = [1, 1]} : vector<8x256xf32> to vector<8x128xf32>
    %10 = arith.negf %9 : vector<8x128xf32>
    %11 = math.exp %10 : vector<8x128xf32>
    %cst_5 = arith.constant 1.000000e+00 : f32
    %12 = vector.broadcast %cst_5 : f32 to vector<8x128xf32>
    %13 = arith.addf %12, %11 : vector<8x128xf32>
    %14 = arith.divf %12, %13 : vector<8x128xf32>
    %15 = arith.mulf %8, %14 : vector<8x128xf32>
    %c0_6 = arith.constant 0 : index
    %c0_7 = arith.constant 0 : index
    %16 = vector.load %arg5[%c0_6, %c0_7] : memref<8x128xf32, #tpu.memory_space<vmem>>, vector<8x128xf32>
    tpu.vector_store %arg5[%c0_6, %c0_7], %15 {strides = array<i32>} : memref<8x128xf32, #tpu.memory_space<vmem>>, vector<8x128xf32>,
    return
  }
  func.func @transform_0(%arg0: i32, %arg1: i32) -> (i32, i32) {
    %c0_i32 = arith.constant 0 : i32
    %c0_i32_0 = arith.constant 0 : i32
    return %arg1, %c0_i32 : i32, i32
  }
  func.func @transform_1(%arg0: i32, %arg1: i32) -> (i32, i32) {
    %c0_i32 = arith.constant 0 : i32
    %c0_i32_0 = arith.constant 0 : i32
    return %c0_i32, %arg0 : i32, i32
  }
  func.func @transform_2(%arg0: i32, %arg1: i32) -> (i32, i32) {
    %c0_i32 = arith.constant 0 : i32
    %c0_i32_0 = arith.constant 0 : i32
    return %c0_i32, %arg0 : i32, i32
  }
  func.func @transform_3(%arg0: i32, %arg1: i32) -> (i32, i32) {
    %c0_i32 = arith.constant 0 : i32
    return %arg1, %arg0 : i32, i32
  }
}

</mosaic_0001>

<bundles_post_ra>
// kernel: tpu_custom_call.1
= control target key start
LH: loop header
LB: loop body
LE: loop exit
PB: predicated region body
PF: predicated region fallthrough
CT: control target
= control target key end

     0   :  { %8 = vsyncpa [#allocation3], 0  ;;  %s375_s0 = inlined_call_operand.hbm [shape: f32[8,128], index: 0, kind: input, shape index: {}]   ;;  %s376_s1 = inlined_call_operand.hbm [shape: bf16[128,256], index: 1, kind: input, shape index: {}]   ;;  %s377_s2 = inlined_call_operand.vmem [shape: f32[1,256], index: 2, kind: input, shape index: {}]   ;;  %s378_s3 = inlined_call_operand.hbm [shape: f32[8,128], index: 3, kind: output, shape index: {}]  }
   0x1   :  { %9 = vsyncpa [#allocation6], 0 }
   0x2   :  { %10 = vsyncpa [#allocation4], 0  ;;  %s337_s12 = smov [#allocation2]   ;;  %s338_s14 = smov [#allocation5]  }
   0x3   :  { %s17_s13 = sshll.u32 %s337_s12, 4  ;;  %s26_s15 = sshll.u32 %s338_s14, 4  ;;  %s18_s13 = int_to_ptr.vmem [resolvable:$true] %s17_s13  ;;  %s27_s15 = int_to_ptr.vmem [resolvable:$true] %s26_s15 }
   0x4   :  { %s279_s16 = scalar_lea.vmem %s18_s13, 128  ;;  %p284_p1 = scmp.lt.s32.totalorder %s18_s13, %s18_s13 }
   0x5   :  { %p280_p0 = scmp.ne.s32.totalorder %s18_s13, %s279_s16  ;;  %p285_p2 = scmp.lt.s32.totalorder %s279_s16, %s279_s16 }
   0x7   :  { %p286_p3 = por %p285_p2, %p284_p1 }
   0x9   :  { %p287_p4 = pnand %p286_p3, %p280_p0 }
   0xb   :  { %290 = shalt.err (!%p287_p4)
}
   0xc   :  { %20 = dma.hbm_to_vmem [thread:$0]  %s375_s0, 128, %s18_s13, [#allocation3]  }
   0xd   :  { %s299_s19 = scalar_lea.vmem %s27_s15, 2048  ;;  %p304_p6 = scmp.lt.s32.totalorder %s27_s15, %s27_s15 }
   0xe   :  { %p300_p5 = scmp.ne.s32.totalorder %s27_s15, %s299_s19  ;;  %p305_p7 = scmp.lt.s32.totalorder %s299_s19, %s299_s19 }
  0x10   :  { %p306_p8 = por %p305_p7, %p304_p6 }
  0x12   :  { %p307_p9 = pnand %p306_p8, %p300_p5 }
  0x14   :  { %310 = shalt.err (!%p307_p9)
}
  0x15   :  { %s339_s20 = smov 128   ;;  %s340_s21 = smov 8  }
  0x16   :  { %32 = dma.hbm_to_vmem [thread:$0]  %s376_s1, 2048, %s27_s15, [#allocation6], %s339_s20, %s339_s20, %s340_s21  }
  0x17   :  { %331 = dma.done.wait [#allocation3], 128  }
  0x18   :  { %332 = vsyncadd [#allocation3], 4294967168 }
  0x19   :  { %333 = dma.done.wait [#allocation6], 2048  }
  0x1a   :  { %334 = vsyncadd [#allocation6], 4294965248  ;;  %v341_v0 = vmov 0   ;;  %v241_v1 = vld [vmem:[#allocation5 + $0x74] ss:$8 sps:$4 sm:$0xff]   ;;  %v62_v19 = vlaneseq  ;;  %s342_s24 = smov [#allocation7]  }
  0x1b   :  { %184 = vmatprep.mubr.bf16.mxu0 %v341_v0  ;;  %v243_v2 = vld [vmem:[#allocation5 + $0x70] ss:$8 sps:$4 sm:$0xff]   ;;  %152 = vmatprep.subr.bf16.mxu0 %v241_v1  ;;  %v244_v3 = vld [vmem:[#allocation5 + $0x64] ss:$8 sps:$4 sm:$0xff]   ;;  %v246_v4 = vld [vmem:[#allocation5 + $0x60] ss:$8 sps:$4 sm:$0xff]  }
  0x1c   :  { %153 = vmatpush1.bf16.msra.mxu0 %v243_v2  ;;  %v247_v5 = vld [vmem:[#allocation5 + $0x54] ss:$8 sps:$4 sm:$0xff]   ;;  %v249_v6 = vld [vmem:[#allocation5 + $0x50] ss:$8 sps:$4 sm:$0xff]   ;;  %v250_v7 = vld [vmem:[#allocation5 + $0x44] ss:$8 sps:$4 sm:$0xff]  }
  0x1d   :  { %154 = vmatprep.subr.bf16.mxu0 %v244_v3  ;;  %v252_v8 = vld [vmem:[#allocation5 + $0x40] ss:$8 sps:$4 sm:$0xff]   ;;  %v253_v9 = vld [vmem:[#allocation5 + $0x34] ss:$8 sps:$4 sm:$0xff]   ;;  %v255_v10 = vld [vmem:[#allocation5 + $0x30] ss:$8 sps:$4 sm:$0xff]  }
  0x1e   :  { %v256_v11 = vld [vmem:[#allocation5 + $0x24] ss:$8 sps:$4 sm:$0xff]   ;;  %v258_v12 = vld [vmem:[#allocation5 + $0x20] ss:$8 sps:$4 sm:$0xff]   ;;  %v259_v13 = vld [vmem:[#allocation5 + $0x14] ss:$8 sps:$4 sm:$0xff]  }
  0x1f   :  { %v261_v14 = vld [vmem:[#allocation5 + $0x10] ss:$8 sps:$4 sm:$0xff]   ;;  %v262_v15 = vld [vmem:[#allocation5 + $0x4] ss:$8 sps:$4 sm:$0xff]   ;;  %v264_v16 = vld [vmem:[#allocation5] ss:$8 sps:$4 sm:$0xff]  }
  0x20   :  { %155 = vmatpush1.bf16.msra.mxu0 %v246_v4  ;;  %v42_v17 = vld [vmem:[#allocation2] sm:$0xff]  ;;  %v63_v20 = vshrl.u32 %v62_v19, 7  ;;  %s208_s25 = sshll.u32 %s342_s24, 4  ;;  %s209_s25 = int_to_ptr.vmem [resolvable:$true] %s208_s25 }
  0x21   :  { %156 = vmatprep.subr.bf16.mxu0 %v247_v5  ;;  %v43_v18 = vpack.c.bf16 %v42_v17, %v42_v17  ;;  %v60_v22 = vld [vmem:[%s377_s2] sm:$0x3]  ;;  %s311_s2 = scalar_lea.vmem %s209_s25, 128  ;;  %p316_p11 = scmp.lt.s32.totalorder %s209_s25, %s209_s25 }
  0x22   :  { %v68_v21 = vsub.s32 1, %v63_v20  ;;  %v64_v30 = vsub.s32 0, %v63_v20  ;;  %p312_p10 = scmp.ne.s32.totalorder %s209_s25, %s311_s2  ;;  %p317_p12 = scmp.lt.s32.totalorder %s311_s2, %s311_s2 }
  0x24   :  { %157 = vmatpush1.bf16.msra.mxu0 %v249_v6  ;;  %v69_v23 = vrot.slane %v60_v22, %v68_v21  ;;  %v65_v31 = vrot.slane %v60_v22, %v64_v30  ;;  %p318_p13 = por %p317_p12, %p316_p11 }
  0x25   :  { %158 = vmatprep.subr.bf16.mxu0 %v250_v7 }
  0x26   :  { %p319_p0 = pnand %p318_p13, %p312_p10 }
  0x28   :  { %159 = vmatpush1.bf16.msra.mxu0 %v252_v8 }
  0x29   :  { %160 = vmatprep.subr.bf16.mxu0 %v253_v9 }
  0x2c   :  { %161 = vmatpush1.bf16.msra.mxu0 %v255_v10 }
  0x2d   :  { %162 = vmatprep.subr.bf16.mxu0 %v256_v11 }
  0x30   :  { %163 = vmatpush1.bf16.msra.mxu0 %v258_v12 }
  0x31   :  { %164 = vmatprep.subr.bf16.mxu0 %v259_v13 }
  0x34   :  { %165 = vmatpush1.bf16.msra.mxu0 %v261_v14 }
  0x35   :  { %166 = vmatprep.subr.bf16.mxu0 %v262_v15 }
  0x38   :  { %167 = vmatpush1.bf16.msra.mxu0 %v264_v16 }
  0x3b   :  { %185 = vmatmul.mubr.bf16.vlgmr.msra.gmra.mxu0 %v43_v18 }
  0xfb   :  { %v186_v24 = vpop.f32.mrf.mxu0 }
  0xfc   :  { %v187_v32 = vadd.f32 %v186_v24, %v65_v31 }
  0xfd   :  { %v188_v25 = vpop.f32.mrf.mxu0 }
  0xfe   :  { %v189_v26 = vadd.f32 %v188_v25, %v69_v23 }
  0xff   :  { %v190_v27 = vpop.f32.mrf.mxu0 }
 0x100   :  { %v234_v28 = vmul.f32 -1.442695, %v189_v26 }
 0x101   :  { %v191_v29 = vpop.f32.mrf.mxu0 }
 0x102   :  { %265 = vpow2.f32 %v234_v28 }
 0x103   :  { %267 = vtanh.f32 %v187_v32 }
 0x10f   :  { %v266_v33 = vpop.eup %265 }
 0x110   :  { %v197_v34 = vadd.f32 1.0, %v266_v33  ;;  %v268_v35 = vpop.eup %267 }
 0x112   :  { %269 = vrcp.f32 %v197_v34 }
 0x11f   :  { %v270_v36 = vpop.eup %269 }
 0x120   :  { %v200_v37 = vmul.f32 %v270_v36, %v268_v35 }
 0x122   :  { %201 = vst [vmem:[#allocation7] sm:$0xff] %v200_v37 }
 0x123   :  { %322 = shalt.err (!%p319_p0)
}
 0x124   :  { %211 = dma.vmem_to_hbm [thread:$0]  %s209_s25, 128, %s378_s3, [#allocation4]  }
 0x125   :  { %335 = dma.done.wait [#allocation4], 128  }
 0x126   :  { %336 = vsyncadd [#allocation4], 4294967168 }
 0x127   :  { %215 = vsyncpa [#allocation3], 1 }
 0x128   :  { %216 = vsyncpa [#allocation6], 1 }
 0x129   :  { %217 = vsyncpa [#allocation4], 1 }

// kernel: tpu_custom_call.1
= control target key start
LH: loop header
LB: loop body
LE: loop exit
PB: predicated region body
PF: predicated region fallthrough
CT: control target
= control target key end

     0   :  { %8 = vsyncpa [#allocation3], 0  ;;  %s375_s0 = inlined_call_operand.hbm [shape: f32[8,128], index: 0, kind: input, shape index: {}]   ;;  %s376_s1 = inlined_call_operand.hbm [shape: bf16[128,256], index: 1, kind: input, shape index: {}]   ;;  %s377_s2 = inlined_call_operand.vmem [shape: f32[1,256], index: 2, kind: input, shape index: {}]   ;;  %s378_s3 = inlined_call_operand.hbm [shape: f32[8,128], index: 3, kind: output, shape index: {}]  }
   0x1   :  { %9 = vsyncpa [#allocation6], 0 }
   0x2   :  { %10 = vsyncpa [#allocation4], 0  ;;  %s337_s12 = smov [#allocation2]   ;;  %s338_s14 = smov [#allocation5]  }
   0x3   :  { %s17_s13 = sshll.u32 %s337_s12, 4  ;;  %s26_s15 = sshll.u32 %s338_s14, 4  ;;  %s18_s13 = int_to_ptr.vmem [resolvable:$true] %s17_s13  ;;  %s27_s15 = int_to_ptr.vmem [resolvable:$true] %s26_s15 }
   0x4   :  { %s279_s16 = scalar_lea.vmem %s18_s13, 128  ;;  %p284_p1 = scmp.lt.s32.totalorder %s18_s13, %s18_s13 }
   0x5   :  { %p280_p0 = scmp.ne.s32.totalorder %s18_s13, %s279_s16  ;;  %p285_p2 = scmp.lt.s32.totalorder %s279_s16, %s279_s16 }
   0x7   :  { %p286_p3 = por %p285_p2, %p284_p1 }
   0x9   :  { %p287_p4 = pnand %p286_p3, %p280_p0 }
   0xb   :  { %290 = shalt.err (!%p287_p4)
}
   0xc   :  { %20 = dma.hbm_to_vmem [thread:$0]  %s375_s0, 128, %s18_s13, [#allocation3]  }
   0xd   :  { %s299_s19 = scalar_lea.vmem %s27_s15, 2048  ;;  %p304_p6 = scmp.lt.s32.totalorder %s27_s15, %s27_s15 }
   0xe   :  { %p300_p5 = scmp.ne.s32.totalorder %s27_s15, %s299_s19  ;;  %p305_p7 = scmp.lt.s32.totalorder %s299_s19, %s299_s19 }
  0x10   :  { %p306_p8 = por %p305_p7, %p304_p6 }
  0x12   :  { %p307_p9 = pnand %p306_p8, %p300_p5 }
  0x14   :  { %310 = shalt.err (!%p307_p9)
}
  0x15   :  { %s339_s20 = smov 128   ;;  %s340_s21 = smov 8  }
  0x16   :  { %32 = dma.hbm_to_vmem [thread:$0]  %s376_s1, 2048, %s27_s15, [#allocation6], %s339_s20, %s339_s20, %s340_s21  }
  0x17   :  { %331 = dma.done.wait [#allocation3], 128  }
  0x18   :  { %332 = vsyncadd [#allocation3], 4294967168 }
  0x19   :  { %333 = dma.done.wait [#allocation6], 2048  }
  0x1a   :  { %334 = vsyncadd [#allocation6], 4294965248  ;;  %v341_v0 = vmov 0   ;;  %v241_v1 = vld [vmem:[#allocation5 + $0x74] ss:$8 sps:$4 sm:$0xff]   ;;  %v62_v19 = vlaneseq  ;;  %s342_s24 = smov [#allocation7]  }
  0x1b   :  { %184 = vmatprep.mubr.bf16.mxu0 %v341_v0  ;;  %v243_v2 = vld [vmem:[#allocation5 + $0x70] ss:$8 sps:$4 sm:$0xff]   ;;  %152 = vmatprep.subr.bf16.mxu0 %v241_v1  ;;  %v244_v3 = vld [vmem:[#allocation5 + $0x64] ss:$8 sps:$4 sm:$0xff]   ;;  %v246_v4 = vld [vmem:[#allocation5 + $0x60] ss:$8 sps:$4 sm:$0xff]  }
  0x1c   :  { %153 = vmatpush1.bf16.msra.mxu0 %v243_v2  ;;  %v247_v5 = vld [vmem:[#allocation5 + $0x54] ss:$8 sps:$4 sm:$0xff]   ;;  %v249_v6 = vld [vmem:[#allocation5 + $0x50] ss:$8 sps:$4 sm:$0xff]   ;;  %v250_v7 = vld [vmem:[#allocation5 + $0x44] ss:$8 sps:$4 sm:$0xff]  }
  0x1d   :  { %154 = vmatprep.subr.bf16.mxu0 %v244_v3  ;;  %v252_v8 = vld [vmem:[#allocation5 + $0x40] ss:$8 sps:$4 sm:$0xff]   ;;  %v253_v9 = vld [vmem:[#allocation5 + $0x34] ss:$8 sps:$4 sm:$0xff]   ;;  %v255_v10 = vld [vmem:[#allocation5 + $0x30] ss:$8 sps:$4 sm:$0xff]  }
  0x1e   :  { %v256_v11 = vld [vmem:[#allocation5 + $0x24] ss:$8 sps:$4 sm:$0xff]   ;;  %v258_v12 = vld [vmem:[#allocation5 + $0x20] ss:$8 sps:$4 sm:$0xff]   ;;  %v259_v13 = vld [vmem:[#allocation5 + $0x14] ss:$8 sps:$4 sm:$0xff]  }
  0x1f   :  { %v261_v14 = vld [vmem:[#allocation5 + $0x10] ss:$8 sps:$4 sm:$0xff]   ;;  %v262_v15 = vld [vmem:[#allocation5 + $0x4] ss:$8 sps:$4 sm:$0xff]   ;;  %v264_v16 = vld [vmem:[#allocation5] ss:$8 sps:$4 sm:$0xff]  }
  0x20   :  { %155 = vmatpush1.bf16.msra.mxu0 %v246_v4  ;;  %v42_v17 = vld [vmem:[#allocation2] sm:$0xff]  ;;  %v63_v20 = vshrl.u32 %v62_v19, 7  ;;  %s208_s25 = sshll.u32 %s342_s24, 4  ;;  %s209_s25 = int_to_ptr.vmem [resolvable:$true] %s208_s25 }
  0x21   :  { %156 = vmatprep.subr.bf16.mxu0 %v247_v5  ;;  %v43_v18 = vpack.c.bf16 %v42_v17, %v42_v17  ;;  %v60_v22 = vld [vmem:[%s377_s2] sm:$0x3]  ;;  %s311_s2 = scalar_lea.vmem %s209_s25, 128  ;;  %p316_p11 = scmp.lt.s32.totalorder %s209_s25, %s209_s25 }
  0x22   :  { %v68_v21 = vsub.s32 1, %v63_v20  ;;  %v64_v30 = vsub.s32 0, %v63_v20  ;;  %p312_p10 = scmp.ne.s32.totalorder %s209_s25, %s311_s2  ;;  %p317_p12 = scmp.lt.s32.totalorder %s311_s2, %s311_s2 }
  0x24   :  { %157 = vmatpush1.bf16.msra.mxu0 %v249_v6  ;;  %v69_v23 = vrot.slane %v60_v22, %v68_v21  ;;  %v65_v31 = vrot.slane %v60_v22, %v64_v30  ;;  %p318_p13 = por %p317_p12, %p316_p11 }
  0x25   :  { %158 = vmatprep.subr.bf16.mxu0 %v250_v7 }
  0x26   :  { %p319_p0 = pnand %p318_p13, %p312_p10 }
  0x28   :  { %159 = vmatpush1.bf16.msra.mxu0 %v252_v8 }
  0x29   :  { %160 = vmatprep.subr.bf16.mxu0 %v253_v9 }
  0x2c   :  { %161 = vmatpush1.bf16.msra.mxu0 %v255_v10 }
  0x2d   :  { %162 = vmatprep.subr.bf16.mxu0 %v256_v11 }
  0x30   :  { %163 = vmatpush1.bf16.msra.mxu0 %v258_v12 }
  0x31   :  { %164 = vmatprep.subr.bf16.mxu0 %v259_v13 }
  0x34   :  { %165 = vmatpush1.bf16.msra.mxu0 %v261_v14 }
  0x35   :  { %166 = vmatprep.subr.bf16.mxu0 %v262_v15 }
  0x38   :  { %167 = vmatpush1.bf16.msra.mxu0 %v264_v16 }
  0x3b   :  { %185 = vmatmul.mubr.bf16.vlgmr.msra.gmra.mxu0 %v43_v18 }
  0xfb   :  { %v186_v24 = vpop.f32.mrf.mxu0 }
  0xfc   :  { %v187_v32 = vadd.f32 %v186_v24, %v65_v31 }
  0xfd   :  { %v188_v25 = vpop.f32.mrf.mxu0 }
  0xfe   :  { %v189_v26 = vadd.f32 %v188_v25, %v69_v23 }
  0xff   :  { %v190_v27 = vpop.f32.mrf.mxu0 }
 0x100   :  { %v234_v28 = vmul.f32 -1.442695, %v189_v26 }
 0x101   :  { %v191_v29 = vpop.f32.mrf.mxu0 }
 0x102   :  { %265 = vpow2.f32 %v234_v28 }
 0x103   :  { %267 = vtanh.f32 %v187_v32 }
 0x10f   :  { %v266_v33 = vpop.eup %265 }
 0x110   :  { %v197_v34 = vadd.f32 1.0, %v266_v33  ;;  %v268_v35 = vpop.eup %267 }
 0x112   :  { %269 = vrcp.f32 %v197_v34 }
 0x11f   :  { %v270_v36 = vpop.eup %269 }
 0x120   :  { %v200_v37 = vmul.f32 %v270_v36, %v268_v35 }
 0x122   :  { %201 = vst [vmem:[#allocation7] sm:$0xff] %v200_v37 }
 0x123   :  { %322 = shalt.err (!%p319_p0)
}
 0x124   :  { %211 = dma.vmem_to_hbm [thread:$0]  %s209_s25, 128, %s378_s3, [#allocation4]  }
 0x125   :  { %335 = dma.done.wait [#allocation4], 128  }
 0x126   :  { %336 = vsyncadd [#allocation4], 4294967168 }
 0x127   :  { %215 = vsyncpa [#allocation3], 1 }
 0x128   :  { %216 = vsyncpa [#allocation6], 1 }
 0x129   :  { %217 = vsyncpa [#allocation4], 1 }

</bundles_post_ra>
